<compile_context>
chip_gen: v7x
topology: tpu7x:2x2x1
jax: 0.10.0
libtpu: 0.0.40
codegen_flags: <defaults>
</compile_context>

<pallas_src>
import jax
import jax.numpy as jnp
from jax.experimental import pallas as pl
from jax.experimental.pallas import tpu as pltpu

HIDDEN = 768      # BERT hidden size (fixed by nn.Linear(768, 16))
NUM_TAGS = 16     # output tag dimension


def _round_up(x, m):
    return ((x + m - 1) // m) * m


def tagger_linear_kernel(h_ref, w_ref, b_ref, o_ref):
    # h_ref: (tr, 768) f32 hidden rows (VMEM) -- cast to bf16 just before MXU
    # w_ref: (768, 16) bf16 weight (resident)
    # b_ref: (1, 16)   f32 bias (resident)
    # o_ref: (tr, 16)  f32 logits
    h_bf = h_ref[...].astype(jnp.bfloat16)
    o_ref[...] = (
        jnp.dot(h_bf, w_ref[...], preferred_element_type=jnp.float32)
        + b_ref[...]
    )


def pos_tagger_head(hidden, w_t, bias, *, tile_rows=1024):
    """hidden: [B, S, 768] f32; w_t: [768, 16]; bias: [16] -> logits [B, S, 16] f32."""
    B, S, H = hidden.shape
    assert H == HIDDEN
    R = B * S

    # Flatten batch*sequence into one row axis; keep native f32 (cast happens
    # in-kernel, so there is no extra HBM convert pass).
    h2 = hidden.reshape(R, H)

    # Tiny, one-shot parameter prep (24 KiB weight, 64 B bias).
    w_bf = w_t.astype(jnp.bfloat16)                  # (768, 16)
    b2 = bias.astype(jnp.float32).reshape(1, NUM_TAGS)

    # Row tile: as large as possible, multiple of 8 (f32 sublane packing).
    rp8 = _round_up(R, 8)
    tr = min(tile_rows, rp8)
    # v7x has 2 TensorCores sharing HBM; make sure the "parallel" row axis has
    # at least 2 grid steps whenever the row count allows it.
    if rp8 // tr < 2 and rp8 >= 16:
        tr = _round_up(max(rp8 // 2, 8), 8)

    Rp = _round_up(R, tr)
    if Rp != R:
        h2 = jnp.pad(h2, ((0, Rp - R), (0, 0)))

    grid = (Rp // tr,)

    out = pl.pallas_call(
        tagger_linear_kernel,
        out_shape=jax.ShapeDtypeStruct((Rp, NUM_TAGS), jnp.float32),
        grid_spec=pltpu.PrefetchScalarGridSpec(
            num_scalar_prefetch=0,
            grid=grid,
            in_specs=[
                # one big row tile of f32 hidden states per grid step
                pl.BlockSpec((tr, H), lambda i: (i, 0)),
                # weight / bias are resident (same block every step; last dim
                # equals the full array dim so 16-wide blocks are legal)
                pl.BlockSpec((H, NUM_TAGS), lambda i: (0, 0)),
                pl.BlockSpec((1, NUM_TAGS), lambda i: (0, 0)),
            ],
            out_specs=pl.BlockSpec((tr, NUM_TAGS), lambda i: (i, 0)),
        ),
        compiler_params=pltpu.CompilerParams(
            dimension_semantics=("parallel",),
            vmem_limit_bytes=32 << 20,   # safe headroom if tile_rows is raised (v5e default is 16 MiB)
        ),
        cost_estimate=pl.CostEstimate(
            flops=2 * Rp * H * NUM_TAGS,
            transcendentals=0,
            bytes_accessed=(Rp * H * 4              # f32 hidden read
                            + H * NUM_TAGS * 2      # bf16 weight read
                            + NUM_TAGS * 4          # f32 bias read
                            + Rp * NUM_TAGS * 4),   # f32 output write
        ),
    )(h2, w_bf, b2)

    # Drop row padding (if any); restore [B, S, 16].
    return out[:R].reshape(B, S, NUM_TAGS)


def synthetic_bert_last_hidden(token_ids, emb_table):
    """Deterministic stand-in for bert(x)[0]: embedding lookup -> [B, S, 768]."""
    return jnp.take(emb_table, token_ids, axis=0)


if __name__ == "__main__":
    B, S = 2, 8            # small batch of token-id sequences
    VOCAB = 100

    key = jax.random.PRNGKey(0)
    k_ids, k_emb, k_w, k_b = jax.random.split(key, 4)

    # x: integer token ids, as fed to BERT in the PyTorch module
    x = jax.random.randint(k_ids, (B, S), 0, VOCAB, dtype=jnp.int32)

    # synthetic "BERT" embedding table (deterministic)
    emb_table = jax.random.normal(k_emb, (VOCAB, HIDDEN), dtype=jnp.float32) * 0.02

    # nn.Linear(768, 16): PyTorch weight is (16, 768); we store its transpose
    w_t = jax.random.normal(k_w, (HIDDEN, NUM_TAGS), dtype=jnp.float32) * 0.02
    bias = jax.random.normal(k_b, (NUM_TAGS,), dtype=jnp.float32) * 0.02

    hidden = synthetic_bert_last_hidden(x, emb_table)       # [B, S, 768] f32
    logits = pos_tagger_head(hidden, w_t, bias)              # [B, S, 16]
    logits = jax.block_until_ready(logits)
    assert logits.shape == (B, S, NUM_TAGS)

    # reference (plain JAX) with the same bf16 rounding, f32 accumulation
    h_bf = hidden.astype(jnp.bfloat16).astype(jnp.float32)
    w_bf = w_t.astype(jnp.bfloat16).astype(jnp.float32)
    ref = jnp.einsum("bsh,ht->bst", h_bf, w_bf) + bias[None, None, :]
    assert jnp.allclose(logits, ref, atol=1e-2, rtol=1e-2)

    # PyTorch returns a list of per-sequence [S, 16] tensors; equivalent view:
    h0 = [logits[i] for i in range(B)]
    assert all(t.shape == (S, NUM_TAGS) for t in h0)

    print("KERNEL_OK")
</pallas_src>

<mosaic_0001>
module attributes {stable_mosaic.version = 11 : i64} {
  func.func @tagger_linear_kernel(%arg0: i32, %arg1: memref<8x768xf32, #tpu.memory_space<vmem>>, %arg2: memref<768x16xbf16, #tpu.memory_space<vmem>>, %arg3: memref<1x16xf32, #tpu.memory_space<vmem>>, %arg4: memref<8x16xf32, #tpu.memory_space<vmem>>) attributes {dimension_semantics = [#tpu.dimension_semantics<parallel>], iteration_bounds = array<i64: 2>, scalar_prefetch = 0 : i64, scratch_operands = 0 : i64, tpu.core_type = #tpu.core_type<tc>, window_params = [{transform_indices = @transform_0, window_bounds = array<i64: 8, 768>}, {pipeline_mode = #tpu.pipeline_mode<synchronous>, transform_indices = @transform_1, window_bounds = array<i64: 768, 16>}, {pipeline_mode = #tpu.pipeline_mode<synchronous>, transform_indices = @transform_2, window_bounds = array<i64: 1, 16>}, {transform_indices = @transform_3, window_bounds = array<i64: 8, 16>}]} {
    %c0 = arith.constant 0 : index
    %c0_0 = arith.constant 0 : index
    %0 = vector.load %arg1[%c0, %c0_0] : memref<8x768xf32, #tpu.memory_space<vmem>>, vector<8x768xf32>
    %1 = arith.truncf %0 : vector<8x768xf32> to vector<8x768xbf16>
    %c0_1 = arith.constant 0 : index
    %c0_2 = arith.constant 0 : index
    %2 = vector.load %arg2[%c0_1, %c0_2] : memref<768x16xbf16, #tpu.memory_space<vmem>>, vector<768x16xbf16>
    %cst = arith.constant dense<0.000000e+00> : vector<8x16xf32>
    %3 = tpu.matmul %1, %2, %cst {dimension_numbers = #tpu.dot_dimension_numbers<[1], [0], [0], [1], [0, 0, 1, 1], [], []>} : vector<8x768xbf16>, vector<768x16xbf16>, vector<8x16xf32> -> vector<8x16xf32>
    %c0_3 = arith.constant 0 : index
    %c0_4 = arith.constant 0 : index
    %4 = vector.load %arg3[%c0_3, %c0_4] : memref<1x16xf32, #tpu.memory_space<vmem>>, vector<1x16xf32>
    %5 = vector.broadcast %4 : vector<1x16xf32> to vector<8x16xf32>
    %6 = arith.addf %3, %5 : vector<8x16xf32>
    %c0_5 = arith.constant 0 : index
    %c0_6 = arith.constant 0 : index
    %7 = vector.load %arg4[%c0_5, %c0_6] : memref<8x16xf32, #tpu.memory_space<vmem>>, vector<8x16xf32>
    tpu.vector_store %arg4[%c0_5, %c0_6], %6 {strides = array<i32>} : memref<8x16xf32, #tpu.memory_space<vmem>>, vector<8x16xf32>,
    return
  }
  func.func @transform_0(%arg0: i32) -> (i32, i32) {
    %c0_i32 = arith.constant 0 : i32
    %c0_i32_0 = arith.constant 0 : i32
    return %arg0, %c0_i32 : i32, i32
  }
  func.func @transform_1(%arg0: i32) -> (i32, i32) {
    %c0_i32 = arith.constant 0 : i32
    %c0_i32_0 = arith.constant 0 : i32
    %c0_i32_1 = arith.constant 0 : i32
    return %c0_i32, %c0_i32_0 : i32, i32
  }
  func.func @transform_2(%arg0: i32) -> (i32, i32) {
    %c0_i32 = arith.constant 0 : i32
    %c0_i32_0 = arith.constant 0 : i32
    %c0_i32_1 = arith.constant 0 : i32
    return %c0_i32, %c0_i32_0 : i32, i32
  }
  func.func @transform_3(%arg0: i32) -> (i32, i32) {
    %c0_i32 = arith.constant 0 : i32
    %c0_i32_0 = arith.constant 0 : i32
    return %arg0, %c0_i32 : i32, i32
  }
}

</mosaic_0001>

<bundles_post_ra>
// kernel: tpu_custom_call.1
= control target key start
LH: loop header
LB: loop body
LE: loop exit
PB: predicated region body
PF: predicated region fallthrough
CT: control target
= control target key end

     0   :  { %8 = vsyncpa [#allocation3], 0  ;;  %s1321_s0 = inlined_call_operand.vmem [shape: f32[16,768], index: 0, kind: input, shape index: {}]   ;;  %s1322_s1 = inlined_call_operand.vmem [shape: bf16[768,16], index: 1, kind: input, shape index: {}]   ;;  %s1323_s2 = inlined_call_operand.vmem [shape: f32[1,16], index: 2, kind: input, shape index: {}]   ;;  %s1324_s3 = inlined_call_operand.hbm [shape: f32[16,16], index: 3, kind: output, shape index: {}]  }
   0x1   :  { %10 = vsyncpa [#allocation3 + $0x1], 0  ;;  %s1066_s12 = smov 0   ;;  %s1068_s13 = smov 0  }
   0x2   :  { %s1070_s14 = smov 0   ;;  %s1072_s15 = smov 0  }
   0x3 LB: > { %s1087_s16 = sadd.s32 4294967295, %s1043_s15   ;;  %s768_s17 = sadd.s32 4294967294, %s1043_s15   ;;  %s1043_s15 = sphi %s1072_s15, %s1330_s15   ;;  %s1039_s14 = sphi %s1070_s14, %s1329_s14   ;;  %s1035_s13 = sphi %s1068_s13, %s1328_s13   ;;  %s1031_s12 = sphi %s1066_s12, %s1327_s12  }
   0x4   : > { %s1091_s18 = sadd.s32 1, %s1043_s15   ;;  %s91_s19 = sadd.s32 1, %s1039_s14 }
   0x5   : > { %s88_s20 = ssub.s32 %s1043_s15, %s1091_s18  ;;  %p101_p0 = scmp.ne.s32.totalorder %s1039_s14, %s1035_s13 }
   0x6   : > { %p89_p1 = scmp.eq.s32.totalorder %s88_s20, 0  ;;  %p102_p2 = scmp.eq.s32.totalorder %s1087_s16, 1 }
   0x7   : > { %p107_p3 = scmp.ne.s32.totalorder %s1035_s13, %s1031_s12  ;;  %p108_p4 = scmp.eq.s32.totalorder %s768_s17, 1 }
   0x8   : > { %s1102_s21 = scalar_select %p89_p1, %s1039_s14, %s91_s19  }
   0x9   : > { %p1104_p5 = por %p102_p2, %p101_p0  ;;  %p1108_p6 = por %p108_p4, %p107_p3 }
   0xa   : > { %p771_p7 = scmp.ge.s32.totalorder %s1043_s15, 1  ;;  %p140_p8 = scmp.lt.s32.totalorder %s1043_s15, 3 }
   0xc   : > { %p141_p9 = pnand %p771_p7, %p140_p8 }
   0xd   : > { %v933_v0 = vld [vmem:[%s1322_s1 + $0x40] sm:$0xff] (!%p141_p9)   ;;  %v937_v4 = vld [vmem:[%s1322_s1 + $0x48] sm:$0xff] (!%p141_p9)   ;;  %v941_v8 = vld [vmem:[%s1322_s1 + $0x50] sm:$0xff] (!%p141_p9)   ;;  %p164_p10 = scmp.lt.s32.totalorder (!%p141_p9), %s1087_s16, 1  ;;  %s824_s19 = sshll.u32 (!%p141_p9), %s1087_s16, 7  ;;  %vm693_vm0 = vcmask (!%p141_p9), 130048  }
   0xe   : > { %144 = sbr.rel (%p141_p9) target bundleno = 309 (0x135), region = 32  ;;  %v934_v1 = vld [vmem:[%s1322_s1] sm:$0xff] (!%p141_p9)   ;;  %827 = vmatprep.subr.bf16.mxu0 (!%p141_p9), %v933_v0  ;;  %v938_v5 = vld [vmem:[%s1322_s1 + $0x8] sm:$0xff] (!%p141_p9)   ;;  %v942_v9 = vld [vmem:[%s1322_s1 + $0x10] sm:$0xff] (!%p141_p9)   ;;  %s1279_s27 = scalar_lea.hbm (!%p141_p9), %s1324_s3, %s824_s19 }
   0xf   : > { %v935_v2 = vld [vmem:[%s1322_s1 + $0xc0] sm:$0xff] (!%p141_p9)   ;;  %828 = vmatpush3.bf16.msra.mxu0 (!%p141_p9), %v934_v1  ;;  %v939_v6 = vld [vmem:[%s1322_s1 + $0xc8] sm:$0xff] (!%p141_p9)   ;;  %v943_v10 = vld [vmem:[%s1322_s1 + $0xd0] sm:$0xff] (!%p141_p9)   ;;  %s1045_s29 = smov (!%p141_p9), [#allocation2]  }
  0x10   : > { %v936_v3 = vld [vmem:[%s1322_s1 + $0x80] sm:$0xff] (!%p141_p9)   ;;  %849 = vmatprep.subr.bf16.mxu1 (!%p141_p9), %v935_v2  ;;  %829 = vmatprep.subr.bf16.mxu0 (!%p141_p9), %v937_v4  ;;  %v940_v7 = vld [vmem:[%s1322_s1 + $0x88] sm:$0xff] (!%p141_p9)   ;;  %v944_v11 = vld [vmem:[%s1322_s1 + $0x90] sm:$0xff] (!%p141_p9)  }
  0x11   : > { %850 = vmatpush3.bf16.msra.mxu1 (!%p141_p9), %v936_v3  ;;  %v945_v12 = vld [vmem:[%s1322_s1 + $0x58] sm:$0xff] (!%p141_p9)   ;;  %v949_v16 = vld [vmem:[%s1322_s1 + $0x60] sm:$0xff] (!%p141_p9)   ;;  %v953_v20 = vld [vmem:[%s1322_s1 + $0x68] sm:$0xff] (!%p141_p9)  }
  0x12   : > { %851 = vmatprep.subr.bf16.mxu1 (!%p141_p9), %v939_v6  ;;  %v946_v13 = vld [vmem:[%s1322_s1 + $0x18] sm:$0xff] (!%p141_p9)   ;;  %v950_v17 = vld [vmem:[%s1322_s1 + $0x20] sm:$0xff] (!%p141_p9)   ;;  %v954_v21 = vld [vmem:[%s1322_s1 + $0x28] sm:$0xff] (!%p141_p9)  }
  0x13   : > { %830 = vmatpush3.bf16.msra.mxu0 (!%p141_p9), %v938_v5  ;;  %v947_v14 = vld [vmem:[%s1322_s1 + $0xd8] sm:$0xff] (!%p141_p9)   ;;  %v951_v18 = vld [vmem:[%s1322_s1 + $0xe0] sm:$0xff] (!%p141_p9)   ;;  %v955_v22 = vld [vmem:[%s1322_s1 + $0xe8] sm:$0xff] (!%p141_p9)  }
  0x14   : > { %831 = vmatprep.subr.bf16.mxu0 (!%p141_p9), %v941_v8  ;;  %v948_v15 = vld [vmem:[%s1322_s1 + $0x98] sm:$0xff] (!%p141_p9)   ;;  %v952_v19 = vld [vmem:[%s1322_s1 + $0xa0] sm:$0xff] (!%p141_p9)   ;;  %v956_v23 = vld [vmem:[%s1322_s1 + $0xa8] sm:$0xff] (!%p141_p9)  }
  0x15   : > { %852 = vmatpush3.bf16.msra.mxu1 %v940_v7  ;;  %s165_s30 = scalar_select %p164_p10, %s1087_s16, 1  ;;  %v957_v24 = vld [vmem:[%s1322_s1 + $0x70] sm:$0xff]   ;;  %v961_v28 = vld [vmem:[%s1322_s1 + $0x78] sm:$0xff]   ;;  %v965_v36 = vld [vmem:[%s1322_s1 + $0x140] sm:$0xff]  }
  0x16   : > { %853 = vmatprep.subr.bf16.mxu1 %v943_v10  ;;  %v958_v25 = vld [vmem:[%s1322_s1 + $0x30] sm:$0xff]   ;;  %v962_v29 = vld [vmem:[%s1322_s1 + $0x38] sm:$0xff]   ;;  %v966_v39 = vld [vmem:[%s1322_s1 + $0x100] sm:$0xff]  }
  0x17   : > { %832 = vmatpush3.bf16.msra.mxu0 %v942_v9  ;;  %s893_s17 = smul.u32 48, %s165_s30  ;;  %v959_v26 = vld [vmem:[%s1322_s1 + $0xf0] sm:$0xff]   ;;  %v963_v30 = vld [vmem:[%s1322_s1 + $0xf8] sm:$0xff]   ;;  %v967_v42 = vld [vmem:[%s1322_s1 + $0x148] sm:$0xff]   ;;  %s985_s30 = sshll.u32 %s1045_s29, 4  ;;  %s986_s30 = int_to_ptr.vmem [resolvable:$false] %s985_s30 }
  0x18   : > { %833 = vmatprep.subr.bf16.mxu0 %v945_v12  ;;  %v960_v27 = vld [vmem:[%s1322_s1 + $0xb0] sm:$0xff]   ;;  %v964_v33 = vld [vmem:[%s1322_s1 + $0xb8] sm:$0xff]   ;;  %v968_v43 = vld [vmem:[%s1322_s1 + $0x108] sm:$0xff]   ;;  %s987_s4 = scalar_lea.vmem %s986_s30, 256 }
  0x19   : > { %854 = vmatpush3.bf16.msra.mxu1 %v944_v11  ;;  %s1206_s5 = scalar_lea.vmem %s1321_s0, %s893_s17  ;;  %v969_v44 = vld [vmem:[%s1322_s1 + $0x150] sm:$0xff]   ;;  %v971_v46 = vld [vmem:[%s1322_s1 + $0x158] sm:$0xff]   ;;  %v973_v48 = vld [vmem:[%s1322_s1 + $0x160] sm:$0xff]  }
  0x1a   : > { %855 = vmatprep.subr.bf16.mxu1 %v947_v14  ;;  %v171_v31 = vld [vmem:[%s1206_s5 + $0x8] sm:$0xff]  ;;  %v170_v34 = vld [vmem:[%s1206_s5] sm:$0xff]  ;;  %v173_v37 = vld [vmem:[%s1206_s5 + $0x18] sm:$0xff] }
  0x1b   : > { %834 = vmatpush3.bf16.msra.mxu0 %v946_v13  ;;  %v177_v32 = vpack.c.bf16 %v171_v31, %v171_v31  ;;  %v176_v35 = vpack.c.bf16 %v170_v34, %v170_v34  ;;  %v179_v38 = vpack.c.bf16 %v173_v37, %v173_v37  ;;  %v172_v40 = vld [vmem:[%s1206_s5 + $0x10] sm:$0xff]  ;;  %v972_v47 = vld [vmem:[%s1322_s1 + $0x118] sm:$0xff]   ;;  %v974_v49 = vld [vmem:[%s1322_s1 + $0x120] sm:$0xff]  }
  0x1c   : > { %835 = vmatprep.subr.bf16.mxu0 %v949_v16  ;;  %v178_v41 = vpack.c.bf16 %v172_v40, %v172_v40  ;;  %v970_v45 = vld [vmem:[%s1322_s1 + $0x110] sm:$0xff]   ;;  %v975_v50 = vld [vmem:[%s1322_s1 + $0x168] sm:$0xff]   ;;  %v979_v56 = vld [vmem:[%s1322_s1 + $0x178] sm:$0xff]  }
  0x1d   : > { %856 = vmatpush3.bf16.msra.mxu1 %v948_v15  ;;  %605 = vmatprep.mubr.bf16.mxu0 %v177_v32  ;;  %v175_v51 = vld [vmem:[%s1206_s5 + $0x28] sm:$0xff]  ;;  %v977_v54 = vld [vmem:[%s1322_s1 + $0x170] sm:$0xff]   ;;  %v980_v57 = vld [vmem:[%s1322_s1 + $0x138] sm:$0xff]  }
  0x1e   : > { %857 = vmatprep.subr.bf16.mxu1 %v951_v18  ;;  %645 = vmatprep.mubr.bf16.mxu1 %v179_v38  ;;  %v181_v52 = vpack.c.bf16 %v175_v51, %v175_v51  ;;  %v976_v53 = vld [vmem:[%s1322_s1 + $0x128] sm:$0xff]   ;;  %v978_v55 = vld [vmem:[%s1322_s1 + $0x130] sm:$0xff]   ;;  %v174_v58 = vld [vmem:[%s1206_s5 + $0x20] sm:$0xff]  ;;  %s161_s5 = sand.u32 1, %s1035_s13  }
  0x1f   : > { %836 = vmatpush3.bf16.msra.mxu0 %v950_v17  ;;  %v180_v59 = vpack.c.bf16 %v174_v58, %v174_v58  ;;  %v774_v61 = vld [vmem:[%s1323_s2] ss:$0 sm:$0xff]  ;;  %s772_s17 = sshll.u32 %s161_s5, 3  ;;  %s696_s28 = scalar_lea.sflag [#allocation3], %s161_s5 }
  0x20   : > { %837 = vmatprep.subr.bf16.mxu0 %v953_v20  ;;  %s163_s20 = scalar_lea.vmem [#allocation2], %s772_s17 }
  0x21   : > { %858 = vmatpush3.bf16.msra.mxu1 %v952_v19  ;;  %s709_s24 = sshll.u32 %s163_s20, 4  ;;  %s1281_s24 = int_to_ptr.vmem [resolvable:$true] %s709_s24 }
  0x22   : > { %859 = vmatprep.subr.bf16.mxu1 %v955_v22  ;;  %s981_s16 = scalar_lea.vmem %s1281_s24, 128  ;;  %p988_p0 = scmp.lt.s32.totalorder %s1281_s24, %s986_s30 }
  0x23   : > { %838 = vmatpush3.bf16.msra.mxu0 %v954_v21  ;;  %p982_p11 = scmp.ne.s32.totalorder %s1281_s24, %s981_s16  ;;  %p989_p1 = scmp.lt.s32.totalorder %s987_s4, %s981_s16 }
  0x24   : > { %839 = vmatprep.subr.bf16.mxu0 %v957_v24 }
  0x25   : > { %860 = vmatpush3.bf16.msra.mxu1 %v956_v23  ;;  %p983_p12 = pnand %p982_p11, %p1104_p5  ;;  %p990_p2 = por %p989_p1, %p988_p0 }
  0x26   : > { %861 = vmatprep.subr.bf16.mxu1 %v959_v26 }
  0x27   : > { %840 = vmatpush3.bf16.msra.mxu0 %v958_v25  ;;  %p984_p13 = pneg %p983_p12 }
  0x28   : > { %841 = vmatprep.subr.bf16.mxu0 %v961_v28 }
  0x29   : > { %862 = vmatpush3.bf16.msra.mxu1 %v960_v27  ;;  %p991_p3 = pnand %p990_p2, %p984_p13 }
  0x2a   : > { %863 = vmatprep.subr.bf16.mxu1 %v963_v30 }
  0x2b   : > { %842 = vmatpush3.bf16.msra.mxu0 %v962_v29 }
  0x2c   : > { %871 = vmatprep.subr.bf16.mxu0 %v965_v36 }
  0x2d   : > { %864 = vmatpush3.bf16.msra.mxu1 %v964_v33 }
  0x2e   : > { %606 = vmatmul.mubr.bf16.vlgmr.msra.gmra.mrb[0].mxu0 %v176_v35 }
  0x2f   : > { %872 = vmatpush3.bf16.msra.mxu0 %v966_v39  ;;  %685 = vmatprep.mubr.bf16.mxu0 %v181_v52 }
  0x30   : > { %646 = vmatmul.mubr.bf16.vlgmr.msra.gmra.mrb[0].mxu1 %v178_v41  ;;  %873 = vmatprep.subr.bf16.mxu0 %v967_v42 }
  0x33   : > { %874 = vmatpush3.bf16.msra.mxu0 %v968_v43 }
  0x34   : > { %875 = vmatprep.subr.bf16.mxu0 %v969_v44 }
  0x37   : > { %876 = vmatpush3.bf16.msra.mxu0 %v970_v45 }
  0x38   : > { %877 = vmatprep.subr.bf16.mxu0 %v971_v46 }
  0x3b   : > { %878 = vmatpush3.bf16.msra.mxu0 %v972_v47 }
  0x3c   : > { %879 = vmatprep.subr.bf16.mxu0 %v973_v48 }
  0x3f   : > { %880 = vmatpush3.bf16.msra.mxu0 %v974_v49 }
  0x40   : > { %881 = vmatprep.subr.bf16.mxu0 %v975_v50 }
  0x43   : > { %882 = vmatpush3.bf16.msra.mxu0 %v976_v53 }
  0x44   : > { %883 = vmatprep.subr.bf16.mxu0 %v977_v54 }
  0x47   : > { %884 = vmatpush3.bf16.msra.mxu0 %v978_v55 }
  0x48   : > { %885 = vmatprep.subr.bf16.mxu0 %v979_v56 }
  0x4b   : > { %886 = vmatpush3.bf16.msra.mxu0 %v980_v57 }
  0x4e   : > { %686 = vmatmul.mubr.bf16.vlgmr.msra.gmra.mrb[4].mxu0 %v180_v59 }
 0x101   : > { %v843_v60 = vpop.f32.mrb[0].mxu0 }
 0x102   : > { %v844_v62 = vpop.f32.mrb[1].mxu0 }
 0x103   : > { %v845_v63 = vadd.f32 %v844_v62, %v843_v60  ;;  %v846_v0 = vpop.f32.mrb[2].mxu0  ;;  %v865_v1 = vpop.f32.mrb[0].mxu1 }
 0x104   : > { %v847_v2 = vpop.f32.mrb[3].mxu0  ;;  %v866_v4 = vpop.f32.mrb[1].mxu1 }
 0x105   : > { %v608_v3 = vadd.f32 %v845_v63, %v774_v61  ;;  %v867_v5 = vadd.f32 %v866_v4, %v865_v1  ;;  %v868_v6 = vpop.f32.mrb[2].mxu1 }
 0x106   : > { %v869_v7 = vpop.f32.mrb[3].mxu1 }
 0x107   : > { %v648_v8 = vadd.f32 %v867_v5, %v608_v3 }
 0x121   : > { %v887_v9 = vpop.f32.mrb[4].mxu0 }
 0x122   : > { %v888_v10 = vpop.f32.mrb[5].mxu0 }
 0x123   : > { %v889_v11 = vadd.f32 %v888_v10, %v887_v9  ;;  %v890_v12 = vpop.f32.mrb[6].mxu0 }
 0x124   : > { %v891_v13 = vpop.f32.mrb[7].mxu0 }
 0x125   : > { %v688_v14 = vadd.f32 %v889_v11, %v648_v8 }
 0x127   : > { %694 = vst.msk [vmem:[%s163_s20] sm:$0xff] %vm693_vm0, %v688_v14 }
 0x128   : > { %994 = shalt.err (!%p991_p3)
}
 0x129   : > { %s995_s6 = scalar_lea.hbm %s1279_s27, 128  ;;  %s999_s9 = scalar_lea.hbm %s1324_s3, 256 }
 0x12a   : > { %p996_p4 = scmp.ne.s32.totalorder %s1279_s27, %s995_s6  ;;  %p1000_p9 = scmp.lt.u32.totalorder %s1279_s27, %s1324_s3 }
 0x12b   : > { %p1001_p10 = scmp.lt.u32.totalorder %s999_s9, %s995_s6  ;;  %p1003_p12 = scmp.lt.u32.totalorder %s995_s6, %s1279_s27 }
 0x12c   : > { %p997_p7 = pnand %p996_p4, %p1104_p5 }
 0x12d   : > { %p1002_p11 = por %p1001_p10, %p1000_p9 }
 0x12e   : > { %p998_p8 = pneg %p997_p7 }
 0x12f   : > { %p1004_p13 = por %p1003_p12, %p1002_p11 }
 0x131   : > { %p1005_p0 = pnand %p1004_p13, %p998_p8 }
 0x133   : > { %1008 = shalt.err (!%p1005_p0)
}
 0x134   : > { %894 = dma.vmem_to_hbm [thread:$0]  (%p1104_p5), %s1281_s24, 128, %s1279_s27, %s696_s28  }
 0x135 PF: > { %p900_p1 = scmp.ge.s32.totalorder %s1043_s15, 2  ;;  %s721_s5 = sand.u32 1, %s1031_s12  }
 0x136   : > { %s722_s17 = scalar_lea.sflag [#allocation3], %s721_s5 }
 0x137   : > { %p897_p2 = pnand %p900_p1, %p1108_p6 }
 0x139   : > { %1026 = dma.done.wait (!%p897_p2), %s722_s17, 128  }
 0x13a   : > { %1028 = vsyncadd (!%p897_p2), %s722_s17, 4294967168  ;;  %p13_p3 = scmp.ge.s32.totalorder %s1091_s18, 4   ;;  %s1327_s12 = smov %s1035_s13 }
 0x13b   : > { %s1328_s13 = smov %s1039_s14  ;;  %s1329_s14 = smov %s1102_s21 }
 0x13c   : > { %s1330_s15 = smov %s1091_s18  ;;  %15 = sbr.rel (!%p13_p3) target bundleno = 3 (0x3), region = 67 }
 0x143   :  { %727 = vsyncpa [#allocation3], 1 }
 0x144   :  { %729 = vsyncpa [#allocation3 + $0x1], 1 }

</bundles_post_ra>
